<compile_context>
chip_gen: v5e
topology: v5e:2x2
jax: 0.10.0
libtpu: 0.0.40
codegen_flags: <defaults>
</compile_context>

<pallas_src>
import functools

import jax
import jax.numpy as jnp
from jax.experimental import pallas as pl
from jax.experimental.pallas import tpu as pltpu


def _svdd_kernel(x_ref,
                 w1_ref, b1_ref,
                 w2_ref, b2_ref,
                 w3_ref, b3_ref,
                 w4_ref, b4_ref,
                 w5_ref, b5_ref,
                 wc_ref,
                 p_ref, q_ref, z_ref):
    """Fused MLP + centroid head for one batch tile."""

    def linear(h, w_ref, b_ref, relu):
        # Matmul operands in the streamed (bf16) dtype, f32 accumulation,
        # bias add + ReLU in f32 on the VPU.
        acc = jnp.dot(h.astype(w_ref.dtype), w_ref[...],
                      preferred_element_type=jnp.float32)
        acc = acc + b_ref[...].astype(jnp.float32)
        return jnp.maximum(acc, 0.0) if relu else acc

    h = x_ref[...]
    h = linear(h, w1_ref, b1_ref, True)       # (TB, hidden)
    h = linear(h, w2_ref, b2_ref, True)       # (TB, hidden/2)
    h = linear(h, w3_ref, b3_ref, True)       # (TB, hidden/4)
    h = linear(h, w4_ref, b4_ref, True)       # (TB, hidden/8)
    z = linear(h, w5_ref, b5_ref, False)      # (TB, latent), f32, no ReLU

    # Centroid: contract wc (1, L) with z (TB, L) over L -> lane-dense (1, TB)
    # row of logits (i.e. (z @ wc.T)^T without an explicit transpose).
    logits = jax.lax.dot_general(
        wc_ref[...].astype(jnp.float32), z,
        dimension_numbers=(((1,), (1,)), ((), ())),
        preferred_element_type=jnp.float32)   # (1, TB)

    q = jax.nn.sigmoid(logits)
    p = (logits >= 0.0).astype(jnp.float32)   # exactly (sigmoid(logits) >= 0.5)

    z_ref[...] = z.astype(z_ref.dtype)
    q_ref[...] = q.astype(q_ref.dtype)
    p_ref[...] = p.astype(p_ref.dtype)


def _round_up(a, m):
    return (a + m - 1) // m * m


@functools.partial(jax.jit, static_argnames=("batch_tile", "mode", "use_bf16"))
def deep_svdd_forward(x, params, *, batch_tile=512, mode="train", use_bf16=True):
    """x: (B, input_dim) float32.  params: dict of (in, out) weights, (1, out)
    biases, and wc == PyTorch Centroid.weight with shape (1, latent)."""
    B, D = x.shape
    latent = params["w5"].shape[1]
    stream_dtype = jnp.bfloat16 if use_bf16 else jnp.float32

    # --- pick a batch tile compatible with TPU layout rules -----------------
    # The lane-dense (1, tile) p/q blocks need tile % 128 == 0 unless the
    # block spans the whole (padded) batch.
    b8 = _round_up(B, 8)
    tile = min(batch_tile, b8)
    if tile < b8:
        tile = _round_up(tile, 128)
        if tile >= b8:
            tile = b8
    B_pad = _round_up(B, tile)

    x_p = x.astype(stream_dtype)
    if B_pad != B:
        x_p = jnp.pad(x_p, ((0, B_pad - B), (0, 0)))

    w1, w2, w3, w4, w5 = (params[f"w{i}"].astype(stream_dtype) for i in range(1, 6))
    b1, b2, b3, b4, b5 = (params[f"b{i}"].astype(jnp.float32) for i in range(1, 6))
    wc = params["wc"].astype(jnp.float32)          # (1, latent)

    grid = (B_pad // tile,)

    def whole(arr):
        return pl.BlockSpec(arr.shape, lambda i: (0,) * arr.ndim)

    in_specs = [
        pl.BlockSpec((tile, D), lambda i: (i, 0)),
        whole(w1), whole(b1),
        whole(w2), whole(b2),
        whole(w3), whole(b3),
        whole(w4), whole(b4),
        whole(w5), whole(b5),
        whole(wc),
    ]
    out_specs = (
        pl.BlockSpec((1, tile), lambda i: (0, i)),        # p (lane-dense)
        pl.BlockSpec((1, tile), lambda i: (0, i)),        # q (lane-dense)
        pl.BlockSpec((tile, latent), lambda i: (i, 0)),   # z (latent features)
    )
    out_shape = (
        jax.ShapeDtypeStruct((1, B_pad), jnp.float32),
        jax.ShapeDtypeStruct((1, B_pad), jnp.float32),
        jax.ShapeDtypeStruct((B_pad, latent), jnp.float32),
    )

    # Advisory cost estimate for the XLA scheduler.
    layer_dims = [w1.shape, w2.shape, w3.shape, w4.shape, w5.shape, (latent, 1)]
    flops = 2 * B_pad * sum(int(k) * int(n) for k, n in layer_dims)
    bytes_accessed = (
        x_p.size * x_p.dtype.itemsize
        + sum(a.size * a.dtype.itemsize
              for a in (w1, b1, w2, b2, w3, b3, w4, b4, w5, b5, wc))
        + B_pad * (latent + 2) * 4)
    cost = pl.CostEstimate(flops=flops, transcendentals=B_pad,
                           bytes_accessed=bytes_accessed)

    p_row, q_row, z_pad = pl.pallas_call(
        _svdd_kernel,
        grid=grid,
        in_specs=in_specs,
        out_specs=out_specs,
        out_shape=out_shape,
        cost_estimate=cost,
        compiler_params=pltpu.CompilerParams(
            dimension_semantics=("parallel",)),
    )(x_p, w1, b1, w2, b2, w3, b3, w4, b4, w5, b5, wc)

    # (1, B_pad) row -> (B, 1) column (same linear order; trivial reshape).
    p = p_row.reshape(B_pad, 1)[:B]
    q = q_row.reshape(B_pad, 1)[:B]
    z = z_pad[:B]

    if mode == "train":
        # PyTorch returns self.Centroid.weight, shape (1, latent_vector).
        return p, q, z, params["wc"]
    return p, q, z


def init_params(key, input_dim, hidden_dim, latent_vector):
    """Deterministic synthetic init.  Layer weights stored as (in, out);
    biases as (1, out); wc stored in PyTorch layout (1, latent)."""
    dims = [
        (input_dim, hidden_dim),
        (hidden_dim, hidden_dim // 2),
        (hidden_dim // 2, hidden_dim // 4),
        (hidden_dim // 4, hidden_dim // 8),
        (hidden_dim // 8, latent_vector),
    ]
    params = {}
    keys = jax.random.split(key, len(dims) * 2 + 1)
    for idx, (fan_in, fan_out) in enumerate(dims):
        bound = 1.0 / jnp.sqrt(fan_in)
        params[f"w{idx + 1}"] = jax.random.uniform(
            keys[2 * idx], (fan_in, fan_out), jnp.float32, -bound, bound)
        params[f"b{idx + 1}"] = jax.random.uniform(
            keys[2 * idx + 1], (1, fan_out), jnp.float32, -bound, bound)
    bound = 1.0 / jnp.sqrt(latent_vector)
    params["wc"] = jax.random.uniform(
        keys[-1], (1, latent_vector), jnp.float32, -bound, bound)
    return params


def _reference_forward(x, params):
    """Pure-JAX f32 reference of the PyTorch forward (eval-mode dropout)."""
    h = x
    for i in range(1, 5):
        h = jnp.maximum(h @ params[f"w{i}"] + params[f"b{i}"], 0.0)
    z = h @ params["w5"] + params["b5"]
    logits = z @ params["wc"].T
    q = jax.nn.sigmoid(logits)
    p = (q >= 0.5).astype(jnp.float32)
    return p, q, z


if __name__ == "__main__":
    config = {
        "input_dim": 32,
        "hidden_dim": 32,
        "latent_vector": 8,
        "drop_out": 0.2,   # identity at inference
        "mode": "train",
    }
    batch = 20  # deliberately not a multiple of the tile -> exercises padding

    key = jax.random.PRNGKey(0)
    k_params, k_x = jax.random.split(key)
    params = init_params(k_params, config["input_dim"],
                         config["hidden_dim"], config["latent_vector"])
    x = jax.random.normal(k_x, (batch, config["input_dim"]), jnp.float32)

    p, q, z, centroid_w = deep_svdd_forward(
        x, params, batch_tile=512, mode=config["mode"], use_bf16=True)
    jax.block_until_ready((p, q, z, centroid_w))

    assert p.shape == (batch, 1)
    assert q.shape == (batch, 1)
    assert z.shape == (batch, config["latent_vector"])
    assert centroid_w.shape == (1, config["latent_vector"])

    # Loose numerical check vs. pure-JAX f32 reference (bf16 streaming tol).
    p_ref, q_ref, z_ref = _reference_forward(x, params)
    assert jnp.all(jnp.isfinite(z)) and jnp.all(jnp.isfinite(q))
    assert jnp.all((p == 0.0) | (p == 1.0))
    assert jnp.allclose(z, z_ref, atol=0.1, rtol=0.1)
    assert jnp.allclose(q, q_ref, atol=0.1, rtol=0.1)

    print("KERNEL_OK")
</pallas_src>

<mosaic_0001>
module attributes {stable_mosaic.version = 11 : i64} {
  func.func @_svdd_kernel(%arg0: i32, %arg1: memref<24x32xbf16, #tpu.memory_space<vmem>>, %arg2: memref<32x32xbf16, #tpu.memory_space<vmem>>, %arg3: memref<1x32xf32, #tpu.memory_space<vmem>>, %arg4: memref<32x16xbf16, #tpu.memory_space<vmem>>, %arg5: memref<1x16xf32, #tpu.memory_space<vmem>>, %arg6: memref<16x8xbf16, #tpu.memory_space<vmem>>, %arg7: memref<1x8xf32, #tpu.memory_space<vmem>>, %arg8: memref<8x4xbf16, #tpu.memory_space<vmem>>, %arg9: memref<1x4xf32, #tpu.memory_space<vmem>>, %arg10: memref<4x8xbf16, #tpu.memory_space<vmem>>, %arg11: memref<1x8xf32, #tpu.memory_space<vmem>>, %arg12: memref<1x8xf32, #tpu.memory_space<vmem>>, %arg13: memref<1x24xf32, #tpu.memory_space<vmem>>, %arg14: memref<1x24xf32, #tpu.memory_space<vmem>>, %arg15: memref<24x8xf32, #tpu.memory_space<vmem>>) attributes {dimension_semantics = [#tpu.dimension_semantics<parallel>], iteration_bounds = array<i64: 1>, scalar_prefetch = 0 : i64, scratch_operands = 0 : i64, tpu.core_type = #tpu.core_type<tc>, window_params = [{transform_indices = @transform_0, window_bounds = array<i64: 24, 32>}, {pipeline_mode = #tpu.pipeline_mode<synchronous>, transform_indices = @transform_1, window_bounds = array<i64: 32, 32>}, {pipeline_mode = #tpu.pipeline_mode<synchronous>, transform_indices = @transform_2, window_bounds = array<i64: 1, 32>}, {pipeline_mode = #tpu.pipeline_mode<synchronous>, transform_indices = @transform_3, window_bounds = array<i64: 32, 16>}, {pipeline_mode = #tpu.pipeline_mode<synchronous>, transform_indices = @transform_4, window_bounds = array<i64: 1, 16>}, {pipeline_mode = #tpu.pipeline_mode<synchronous>, transform_indices = @transform_5, window_bounds = array<i64: 16, 8>}, {pipeline_mode = #tpu.pipeline_mode<synchronous>, transform_indices = @transform_6, window_bounds = array<i64: 1, 8>}, {pipeline_mode = #tpu.pipeline_mode<synchronous>, transform_indices = @transform_7, window_bounds = array<i64: 8, 4>}, {pipeline_mode = #tpu.pipeline_mode<synchronous>, transform_indices = @transform_8, window_bounds = array<i64: 1, 4>}, {pipeline_mode = #tpu.pipeline_mode<synchronous>, transform_indices = @transform_9, window_bounds = array<i64: 4, 8>}, {pipeline_mode = #tpu.pipeline_mode<synchronous>, transform_indices = @transform_10, window_bounds = array<i64: 1, 8>}, {pipeline_mode = #tpu.pipeline_mode<synchronous>, transform_indices = @transform_11, window_bounds = array<i64: 1, 8>}, {transform_indices = @transform_12, window_bounds = array<i64: 1, 24>}, {transform_indices = @transform_13, window_bounds = array<i64: 1, 24>}, {transform_indices = @transform_14, window_bounds = array<i64: 24, 8>}]} {
    %c0 = arith.constant 0 : index
    %c0_0 = arith.constant 0 : index
    %0 = vector.load %arg1[%c0, %c0_0] : memref<24x32xbf16, #tpu.memory_space<vmem>>, vector<24x32xbf16>
    %c0_1 = arith.constant 0 : index
    %c0_2 = arith.constant 0 : index
    %1 = vector.load %arg2[%c0_1, %c0_2] : memref<32x32xbf16, #tpu.memory_space<vmem>>, vector<32x32xbf16>
    %cst = arith.constant dense<0.000000e+00> : vector<24x32xf32>
    %2 = tpu.matmul %0, %1, %cst {dimension_numbers = #tpu.dot_dimension_numbers<[1], [0], [0], [1], [0, 0, 1, 1], [], []>} : vector<24x32xbf16>, vector<32x32xbf16>, vector<24x32xf32> -> vector<24x32xf32>
    %c0_3 = arith.constant 0 : index
    %c0_4 = arith.constant 0 : index
    %3 = vector.load %arg3[%c0_3, %c0_4] : memref<1x32xf32, #tpu.memory_space<vmem>>, vector<1x32xf32>
    %4 = vector.broadcast %3 : vector<1x32xf32> to vector<24x32xf32>
    %5 = arith.addf %2, %4 : vector<24x32xf32>
    %cst_5 = arith.constant 0.000000e+00 : f32
    %6 = vector.broadcast %cst_5 : f32 to vector<24x32xf32>
    %7 = arith.maximumf %5, %6 : vector<24x32xf32>
    %8 = arith.truncf %7 : vector<24x32xf32> to vector<24x32xbf16>
    %c0_6 = arith.constant 0 : index
    %c0_7 = arith.constant 0 : index
    %9 = vector.load %arg4[%c0_6, %c0_7] : memref<32x16xbf16, #tpu.memory_space<vmem>>, vector<32x16xbf16>
    %cst_8 = arith.constant dense<0.000000e+00> : vector<24x16xf32>
    %10 = tpu.matmul %8, %9, %cst_8 {dimension_numbers = #tpu.dot_dimension_numbers<[1], [0], [0], [1], [0, 0, 1, 1], [], []>} : vector<24x32xbf16>, vector<32x16xbf16>, vector<24x16xf32> -> vector<24x16xf32>
    %c0_9 = arith.constant 0 : index
    %c0_10 = arith.constant 0 : index
    %11 = vector.load %arg5[%c0_9, %c0_10] : memref<1x16xf32, #tpu.memory_space<vmem>>, vector<1x16xf32>
    %12 = vector.broadcast %11 : vector<1x16xf32> to vector<24x16xf32>
    %13 = arith.addf %10, %12 : vector<24x16xf32>
    %cst_11 = arith.constant 0.000000e+00 : f32
    %14 = vector.broadcast %cst_11 : f32 to vector<24x16xf32>
    %15 = arith.maximumf %13, %14 : vector<24x16xf32>
    %16 = arith.truncf %15 : vector<24x16xf32> to vector<24x16xbf16>
    %c0_12 = arith.constant 0 : index
    %c0_13 = arith.constant 0 : index
    %17 = vector.load %arg6[%c0_12, %c0_13] : memref<16x8xbf16, #tpu.memory_space<vmem>>, vector<16x8xbf16>
    %cst_14 = arith.constant dense<0.000000e+00> : vector<24x8xf32>
    %18 = tpu.matmul %16, %17, %cst_14 {dimension_numbers = #tpu.dot_dimension_numbers<[1], [0], [0], [1], [0, 0, 1, 1], [], []>} : vector<24x16xbf16>, vector<16x8xbf16>, vector<24x8xf32> -> vector<24x8xf32>
    %c0_15 = arith.constant 0 : index
    %c0_16 = arith.constant 0 : index
    %19 = vector.load %arg7[%c0_15, %c0_16] : memref<1x8xf32, #tpu.memory_space<vmem>>, vector<1x8xf32>
    %20 = vector.broadcast %19 : vector<1x8xf32> to vector<24x8xf32>
    %21 = arith.addf %18, %20 : vector<24x8xf32>
    %cst_17 = arith.constant 0.000000e+00 : f32
    %22 = vector.broadcast %cst_17 : f32 to vector<24x8xf32>
    %23 = arith.maximumf %21, %22 : vector<24x8xf32>
    %24 = arith.truncf %23 : vector<24x8xf32> to vector<24x8xbf16>
    %c0_18 = arith.constant 0 : index
    %c0_19 = arith.constant 0 : index
    %25 = vector.load %arg8[%c0_18, %c0_19] : memref<8x4xbf16, #tpu.memory_space<vmem>>, vector<8x4xbf16>
    %cst_20 = arith.constant dense<0.000000e+00> : vector<24x4xf32>
    %26 = tpu.matmul %24, %25, %cst_20 {dimension_numbers = #tpu.dot_dimension_numbers<[1], [0], [0], [1], [0, 0, 1, 1], [], []>} : vector<24x8xbf16>, vector<8x4xbf16>, vector<24x4xf32> -> vector<24x4xf32>
    %c0_21 = arith.constant 0 : index
    %c0_22 = arith.constant 0 : index
    %27 = vector.load %arg9[%c0_21, %c0_22] : memref<1x4xf32, #tpu.memory_space<vmem>>, vector<1x4xf32>
    %28 = vector.broadcast %27 : vector<1x4xf32> to vector<24x4xf32>
    %29 = arith.addf %26, %28 : vector<24x4xf32>
    %cst_23 = arith.constant 0.000000e+00 : f32
    %30 = vector.broadcast %cst_23 : f32 to vector<24x4xf32>
    %31 = arith.maximumf %29, %30 : vector<24x4xf32>
    %32 = arith.truncf %31 : vector<24x4xf32> to vector<24x4xbf16>
    %c0_24 = arith.constant 0 : index
    %c0_25 = arith.constant 0 : index
    %33 = vector.load %arg10[%c0_24, %c0_25] : memref<4x8xbf16, #tpu.memory_space<vmem>>, vector<4x8xbf16>
    %cst_26 = arith.constant dense<0.000000e+00> : vector<24x8xf32>
    %34 = tpu.matmul %32, %33, %cst_26 {dimension_numbers = #tpu.dot_dimension_numbers<[1], [0], [0], [1], [0, 0, 1, 1], [], []>} : vector<24x4xbf16>, vector<4x8xbf16>, vector<24x8xf32> -> vector<24x8xf32>
    %c0_27 = arith.constant 0 : index
    %c0_28 = arith.constant 0 : index
    %35 = vector.load %arg11[%c0_27, %c0_28] : memref<1x8xf32, #tpu.memory_space<vmem>>, vector<1x8xf32>
    %36 = vector.broadcast %35 : vector<1x8xf32> to vector<24x8xf32>
    %37 = arith.addf %34, %36 : vector<24x8xf32>
    %c0_29 = arith.constant 0 : index
    %c0_30 = arith.constant 0 : index
    %38 = vector.load %arg12[%c0_29, %c0_30] : memref<1x8xf32, #tpu.memory_space<vmem>>, vector<1x8xf32>
    %cst_31 = arith.constant dense<0.000000e+00> : vector<1x24xf32>
    %39 = tpu.matmul %38, %37, %cst_31 {dimension_numbers = #tpu.dot_dimension_numbers<[1], [1], [0], [0], [0, 0, 1, 0], [], []>} : vector<1x8xf32>, vector<24x8xf32>, vector<1x24xf32> -> vector<1x24xf32>
    %40 = arith.negf %39 : vector<1x24xf32>
    %41 = math.exp %40 : vector<1x24xf32>
    %cst_32 = arith.constant 1.000000e+00 : f32
    %42 = vector.broadcast %cst_32 : f32 to vector<1x24xf32>
    %43 = arith.addf %42, %41 : vector<1x24xf32>
    %44 = arith.divf %42, %43 : vector<1x24xf32>
    %cst_33 = arith.constant 0.000000e+00 : f32
    %45 = vector.broadcast %cst_33 : f32 to vector<1x24xf32>
    %46 = arith.cmpf oge, %39, %45 : vector<1x24xf32>
    %47 = arith.extui %46 : vector<1x24xi1> to vector<1x24xi32>
    %48 = arith.sitofp %47 : vector<1x24xi32> to vector<1x24xf32>
    %c0_34 = arith.constant 0 : index
    %c0_35 = arith.constant 0 : index
    %49 = vector.load %arg15[%c0_34, %c0_35] : memref<24x8xf32, #tpu.memory_space<vmem>>, vector<24x8xf32>
    tpu.vector_store %arg15[%c0_34, %c0_35], %37 {strides = array<i32>} : memref<24x8xf32, #tpu.memory_space<vmem>>, vector<24x8xf32>,
    %c0_36 = arith.constant 0 : index
    %c0_37 = arith.constant 0 : index
    %50 = vector.load %arg14[%c0_36, %c0_37] : memref<1x24xf32, #tpu.memory_space<vmem>>, vector<1x24xf32>
    tpu.vector_store %arg14[%c0_36, %c0_37], %44 {strides = array<i32>} : memref<1x24xf32, #tpu.memory_space<vmem>>, vector<1x24xf32>,
    %c0_38 = arith.constant 0 : index
    %c0_39 = arith.constant 0 : index
    %51 = vector.load %arg13[%c0_38, %c0_39] : memref<1x24xf32, #tpu.memory_space<vmem>>, vector<1x24xf32>
    tpu.vector_store %arg13[%c0_38, %c0_39], %48 {strides = array<i32>} : memref<1x24xf32, #tpu.memory_space<vmem>>, vector<1x24xf32>,
    return
  }
  func.func @transform_0(%arg0: i32) -> (i32, i32) {
    %c0_i32 = arith.constant 0 : i32
    %c0_i32_0 = arith.constant 0 : i32
    return %arg0, %c0_i32 : i32, i32
  }
  func.func @transform_1(%arg0: i32) -> (i32, i32) {
    %c0_i32 = arith.constant 0 : i32
    %c0_i32_0 = arith.constant 0 : i32
    %c0_i32_1 = arith.constant 0 : i32
    return %c0_i32, %c0_i32_0 : i32, i32
  }
  func.func @transform_2(%arg0: i32) -> (i32, i32) {
    %c0_i32 = arith.constant 0 : i32
    %c0_i32_0 = arith.constant 0 : i32
    %c0_i32_1 = arith.constant 0 : i32
    return %c0_i32, %c0_i32_0 : i32, i32
  }
  func.func @transform_3(%arg0: i32) -> (i32, i32) {
    %c0_i32 = arith.constant 0 : i32
    %c0_i32_0 = arith.constant 0 : i32
    %c0_i32_1 = arith.constant 0 : i32
    return %c0_i32, %c0_i32_0 : i32, i32
  }
  func.func @transform_4(%arg0: i32) -> (i32, i32) {
    %c0_i32 = arith.constant 0 : i32
    %c0_i32_0 = arith.constant 0 : i32
    %c0_i32_1 = arith.constant 0 : i32
    return %c0_i32, %c0_i32_0 : i32, i32
  }
  func.func @transform_5(%arg0: i32) -> (i32, i32) {
    %c0_i32 = arith.constant 0 : i32
    %c0_i32_0 = arith.constant 0 : i32
    %c0_i32_1 = arith.constant 0 : i32
    return %c0_i32, %c0_i32_0 : i32, i32
  }
  func.func @transform_6(%arg0: i32) -> (i32, i32) {
    %c0_i32 = arith.constant 0 : i32
    %c0_i32_0 = arith.constant 0 : i32
    %c0_i32_1 = arith.constant 0 : i32
    return %c0_i32, %c0_i32_0 : i32, i32
  }
  func.func @transform_7(%arg0: i32) -> (i32, i32) {
    %c0_i32 = arith.constant 0 : i32
    %c0_i32_0 = arith.constant 0 : i32
    %c0_i32_1 = arith.constant 0 : i32
    return %c0_i32, %c0_i32_0 : i32, i32
  }
  func.func @transform_8(%arg0: i32) -> (i32, i32) {
    %c0_i32 = arith.constant 0 : i32
    %c0_i32_0 = arith.constant 0 : i32
    %c0_i32_1 = arith.constant 0 : i32
    return %c0_i32, %c0_i32_0 : i32, i32
  }
  func.func @transform_9(%arg0: i32) -> (i32, i32) {
    %c0_i32 = arith.constant 0 : i32
    %c0_i32_0 = arith.constant 0 : i32
    %c0_i32_1 = arith.constant 0 : i32
    return %c0_i32, %c0_i32_0 : i32, i32
  }
  func.func @transform_10(%arg0: i32) -> (i32, i32) {
    %c0_i32 = arith.constant 0 : i32
    %c0_i32_0 = arith.constant 0 : i32
    %c0_i32_1 = arith.constant 0 : i32
    return %c0_i32, %c0_i32_0 : i32, i32
  }
  func.func @transform_11(%arg0: i32) -> (i32, i32) {
    %c0_i32 = arith.constant 0 : i32
    %c0_i32_0 = arith.constant 0 : i32
    %c0_i32_1 = arith.constant 0 : i32
    return %c0_i32, %c0_i32_0 : i32, i32
  }
  func.func @transform_12(%arg0: i32) -> (i32, i32) {
    %c0_i32 = arith.constant 0 : i32
    %c0_i32_0 = arith.constant 0 : i32
    return %c0_i32, %arg0 : i32, i32
  }
  func.func @transform_13(%arg0: i32) -> (i32, i32) {
    %c0_i32 = arith.constant 0 : i32
    %c0_i32_0 = arith.constant 0 : i32
    return %c0_i32, %arg0 : i32, i32
  }
  func.func @transform_14(%arg0: i32) -> (i32, i32) {
    %c0_i32 = arith.constant 0 : i32
    %c0_i32_0 = arith.constant 0 : i32
    return %arg0, %c0_i32 : i32, i32
  }
}

</mosaic_0001>

<bundles_post_ra>
// kernel: deep_svdd_forward.1
= control target key start
LH: loop header
LB: loop body
LE: loop exit
PB: predicated region body
PF: predicated region fallthrough
CT: control target
= control target key end

     0   :  { %vm76_vm0 = vcmask 261120   ;;  %vm167_vm1 = vcmask 130048   ;;  %vm209_vm2 = vcmask 1043456   ;;  %vm202_vm3 = vcmask 64512   ;;  %s551_s1 = inlined_call_operand.vmem [shape: bf16[32,32], index: 1, kind: input, shape index: {}]   ;;  %s552_s2 = inlined_call_operand.vmem [shape: f32[1,32], index: 2, kind: input, shape index: {}]   ;;  %s553_s0 = inlined_call_operand.vmem [shape: bf16[24,32], index: 0, kind: input, shape index: {}]   ;;  %s554_s4 = inlined_call_operand.vmem [shape: f32[1,16], index: 4, kind: input, shape index: {}]   ;;  %s555_s3 = inlined_call_operand.vmem [shape: bf16[32,16], index: 3, kind: input, shape index: {}]   ;;  %s556_s6 = inlined_call_operand.vmem [shape: f32[1,8], index: 6, kind: input, shape index: {}]   ;;  %s557_s5 = inlined_call_operand.vmem [shape: bf16[16,8], index: 5, kind: input, shape index: {}]   ;;  %s558_s8 = inlined_call_operand.vmem [shape: f32[1,4], index: 8, kind: input, shape index: {}]   ;;  %s559_s7 = inlined_call_operand.vmem [shape: bf16[8,4], index: 7, kind: input, shape index: {}]   ;;  %s560_s10 = inlined_call_operand.vmem [shape: f32[1,8], index: 10, kind: input, shape index: {}]   ;;  %s561_s9 = inlined_call_operand.vmem [shape: bf16[4,8], index: 9, kind: input, shape index: {}]   ;;  %s562_s14 = inlined_call_operand.vmem [shape: f32[24,8], index: 14, kind: output, shape index: {2}]   ;;  %s563_s11 = inlined_call_operand.vmem [shape: f32[1,8], index: 11, kind: input, shape index: {}]   ;;  %s564_s12 = inlined_call_operand.vmem [shape: f32[1,24], index: 12, kind: output, shape index: {0}]   ;;  %s565_s13 = inlined_call_operand.vmem [shape: f32[1,24], index: 13, kind: output, shape index: {1}]  }
   0x1   :  { %v385_v0 = vld [vmem:[%s551_s1 + $0x8] sm:$0xff]  ;;  %v384_v1 = vld [vmem:[%s551_s1] sm:$0xff]  ;;  %vm248_vm4 = vcmask 1041408   ;;  %vm241_vm5 = vcmask 31744   ;;  %vm328_vm6 = vcmask 188416  }
   0x2   :  { %89 = vmatpush.bf16.msra.mxu0 %v385_v0  ;;  %v383_v2 = vld [vmem:[%s553_s0] sm:$0xff]  ;;  %v47_v3 = vld [vmem:[%s553_s0 + $0x8] sm:$0xf] }
   0x3   :  { %v61_v4 = vunpack.c.l.b16 %v47_v3  ;;  %v387_v6 = vld [vmem:[%s555_s3 + $0x8] sm:$0xff]  ;;  %v386_v7 = vld [vmem:[%s555_s3] sm:$0xff] }
   0x4   :  { %138 = vmatpush.bf16.msra.mxu1 %v387_v6  ;;  %v391_v9 = vld [vmem:[%s552_s2] ss:$0 sm:$0xff] }
   0x5   :  { %v63_v5 = vpack.c.b16 %v61_v4, %v61_v4  ;;  %v388_v21 = vld [vmem:[%s557_s5] sm:$0xff] }
   0x6   :  { %90 = vmatpush.bf16.msra.mxu0 %v384_v1  ;;  %389 = vmatpush.bf16.msra.mxu2 %v388_v21  ;;  %v392_v23 = vld [vmem:[%s554_s4] ss:$0 sm:$0xff] }
   0x7   :  { %v197_v35 = vld [vmem:[%s559_s7] sm:$0xf] }
   0x8   :  { %139 = vmatpush.bf16.msra.mxu1 %v386_v7  ;;  %v211_v36 = vsel %vm209_vm2, %v197_v35, 0  ;;  %v393_v38 = vld [vmem:[%s556_s6] ss:$0 sm:$0xff] }
   0x9   :  { %355 = vmatmul.msk.bf16.vlgmr.msra.gmra.mxu0 %vm76_vm0, %v383_v2  ;;  %220 = vmatpush.bf16.msra.mxu3 %v211_v36  ;;  %v236_v50 = vld [vmem:[%s561_s9] sm:$0x3] }
   0xa   :  { %181 = vmatpush.bf16.msrb.mxu0 %v388_v21  ;;  %v250_v51 = vsel %vm248_vm4, %v236_v50, 0  ;;  %v394_v53 = vld [vmem:[%s558_s8] ss:$0 sm:$0xff] }
   0xb   :  { %259 = vmatpush.bf16.msrb.mxu2 %v250_v51  ;;  %v395_v1 = vld [vmem:[%s560_s10] ss:$0 sm:$0xff] }
  0x19   :  { %356 = vmatmul.msk.bf16.gmra.mxu0 %vm76_vm0, %v63_v5 }
  0x86   :  { %v92_v8 = vpop.f32.mrf.mxu0 }
  0x87   :  { %v93_v10 = vadd.f32 %v391_v9, %v92_v8 }
  0x89   :  { %v101_v13 = vmax.f32 %v93_v10, 0.0 }
  0x8e   :  { %v94_v11 = vpop.f32.mrf.mxu0 }
  0x8f   :  { %v95_v12 = vadd.f32 %v391_v9, %v94_v11 }
  0x91   :  { %v102_v14 = vmax.f32 %v95_v12, 0.0  ;;  %v400_v12 = vmov 0.0  }
  0x93   :  { %v104_v15 = vpack.c.bf16 %v102_v14, %v101_v13 }
  0x95   :  { %365 = vmatmul.msk.bf16.vlgmr.msra.gmra.mxu1 %vm76_vm0, %v104_v15 }
  0x96   :  { %v97_v16 = vpop.f32.mrf.mxu0 }
  0x97   :  { %v98_v17 = vadd.f32 %v391_v9, %v97_v16  ;;  %v270_v9 = vld [vmem:[%s563_s11] sm:$0x1] }
  0x99   :  { %v103_v18 = vmax.f32 %v98_v17, 0.0 }
  0x9b   :  { %v105_v20 = vpack.c.bf16 %v103_v18, %v103_v18 }
  0x9e   :  { %v99_v19 = vpop.f32.mrf.mxu0 }
  0xa5   :  { %366 = vmatmul.msk.bf16.gmra.mxu1 %vm76_vm0, %v105_v20 }
 0x112   :  { %v141_v22 = vpop.f32.mrf.mxu1 }
 0x113   :  { %v142_v24 = vadd.f32 %v392_v23, %v141_v22 }
 0x115   :  { %v150_v27 = vmax.f32 %v142_v24, 0.0 }
 0x11a   :  { %v143_v25 = vpop.f32.mrf.mxu1 }
 0x11b   :  { %v144_v26 = vadd.f32 %v392_v23, %v143_v25 }
 0x11d   :  { %v151_v28 = vmax.f32 %v144_v26, 0.0 }
 0x11f   :  { %v153_v29 = vpack.c.bf16 %v151_v28, %v150_v27 }
 0x121   :  { %371 = vmatmul.msk.bf16.vlgmr.msrb.gmra.mxu0 %vm167_vm1, %v153_v29 }
 0x122   :  { %v146_v30 = vpop.f32.mrf.mxu1 }
 0x123   :  { %v147_v31 = vadd.f32 %v392_v23, %v146_v30 }
 0x125   :  { %v152_v32 = vmax.f32 %v147_v31, 0.0 }
 0x127   :  { %v154_v33 = vpack.c.bf16 %v152_v32, %v152_v32 }
 0x129   :  { %372 = vmatmul.msk.bf16.vlgmr.msra.gmra.mxu2 %vm167_vm1, %v154_v33 }
 0x12a   :  { %v148_v34 = vpop.f32.mrf.mxu1 }
 0x19e   :  { %v183_v37 = vpop.f32.mrf.mxu0 }
 0x19f   :  { %v184_v39 = vadd.f32 %v393_v38, %v183_v37 }
 0x1a1   :  { %v192_v42 = vmax.f32 %v184_v39, 0.0 }
 0x1a6   :  { %v185_v40 = vpop.f32.mrf.mxu0 }
 0x1a7   :  { %v186_v41 = vadd.f32 %v393_v38, %v185_v40 }
 0x1a9   :  { %v193_v43 = vmax.f32 %v186_v41, 0.0 }
 0x1ab   :  { %v195_v44 = vpack.c.bf16 %v193_v43, %v192_v42 }
 0x1ac   :  { %v188_v45 = vpop.f32.mrf.mxu2 }
 0x1ad   :  { %373 = vmatmul.msk.bf16.vlgmr.msra.gmra.mxu3 %vm202_vm3, %v195_v44  ;;  %v189_v46 = vadd.f32 %v393_v38, %v188_v45 }
 0x1af   :  { %v194_v48 = vmax.f32 %v189_v46, 0.0 }
 0x1b1   :  { %v196_v49 = vpack.c.bf16 %v194_v48, %v194_v48 }
 0x1b4   :  { %v190_v47 = vpop.f32.mrf.mxu2 }
 0x1bd   :  { %374 = vmatmul.msk.bf16.gmra.mxu3 %vm202_vm3, %v196_v49 }
 0x230   :  { %v222_v52 = vpop.f32.mrf.mxu3 }
 0x231   :  { %v223_v54 = vadd.f32 %v394_v53, %v222_v52 }
 0x233   :  { %v231_v57 = vmax.f32 %v223_v54, 0.0 }
 0x238   :  { %v224_v55 = vpop.f32.mrf.mxu3 }
 0x239   :  { %v225_v56 = vadd.f32 %v394_v53, %v224_v55 }
 0x23b   :  { %v232_v58 = vmax.f32 %v225_v56, 0.0 }
 0x23d   :  { %v234_v59 = vpack.c.bf16 %v232_v58, %v231_v57 }
 0x23f   :  { %375 = vmatmul.msk.bf16.vlgmr.msrb.gmra.mxu2 %vm241_vm5, %v234_v59 }
 0x240   :  { %v227_v60 = vpop.f32.mrf.mxu3 }
 0x241   :  { %v228_v61 = vadd.f32 %v394_v53, %v227_v60 }
 0x243   :  { %v233_v62 = vmax.f32 %v228_v61, 0.0 }
 0x245   :  { %v235_v0 = vpack.c.bf16 %v233_v62, %v233_v62 }
 0x248   :  { %v229_v63 = vpop.f32.mrf.mxu3 }
 0x24f   :  { %376 = vmatmul.msk.bf16.gmra.mxu2 %vm241_vm5, %v235_v0 }
 0x2c2   :  { %v261_v2 = vpop.f32.mrf.mxu2 }
 0x2c3   :  { %v262_v3 = vadd.f32 %v395_v1, %v261_v2 }
 0x2c5   :  { %325 = vst.msk [vmem:[%s562_s14] sm:$0xff] %vm202_vm3, %v262_v3 }
 0x2ca   :  { %v263_v4 = vpop.f32.mrf.mxu2 }
 0x2cb   :  { %v264_v5 = vadd.f32 %v395_v1, %v263_v4 }
 0x2cd   :  { %326 = vst.msk [vmem:[%s562_s14 + $0x8] sm:$0xff] %vm202_vm3, %v264_v5 }
 0x2d2   :  { %v266_v6 = vpop.f32.mrf.mxu2 }
 0x2d3   :  { %v267_v7 = vadd.f32 %v395_v1, %v266_v6 }
 0x2d5   :  { %327 = vst.msk [vmem:[%s562_s14 + $0x10] sm:$0xff] %vm202_vm3, %v267_v7  ;;  %377 = vmatpush.xpose.msk.msrb.mxu3 %vm202_vm3, %v267_v7 }
 0x2d9   :  { %378 = vmatpush.xpose.msk.msrb.mxu3 %vm202_vm3, %v264_v5 }
 0x2da   :  { %v268_v8 = vpop.f32.mrf.mxu2 }
 0x2dd   :  { %379 = vmatpush.xpose.msk.msrb.mxu3 %vm202_vm3, %v262_v3 }
 0x2e0   :  { %380 = vmatmul.msk.f32.vlgmr.msrb.gmra.mxu3 %vm202_vm3, %v270_v9 }
 0x363   :  { %v300_v10 = vpop.f32.mrf.mxu3 }
 0x364   :  { %v381_v11 = vmul.f32 -1.442695, %v300_v10  ;;  %vm322_vm7 = vcmp.ge.f32.partialorder %v300_v10, 0.0 }
 0x365   :  { %v382_v13 = vsel %vm322_vm7, 1.0, %v400_v12 }
 0x366   :  { %396 = vpow2.f32 %v381_v11  ;;  %330 = vst.msk [vmem:[%s564_s12] sm:$0x1] %vm328_vm6, %v382_v13 }
 0x36c   :  { %v397_v14 = vpop.eup %396 }
 0x36d   :  { %v306_v15 = vadd.f32 1.0, %v397_v14 }
 0x36f   :  { %398 = vrcp.f32 %v306_v15  ;;  %v318_v19 = vand.u32 2147483648, %v306_v15  ;;  %v316_v21 = vand.u32 2147483647, %v306_v15  ;;  %vm312_vm9 = vweird.f32 %v306_v15 }
 0x371   :  { %v319_v23 = vor.u32 1.1754944e-38, %v318_v19  ;;  %vm317_vm11 = vcmp.eq.f32.partialorder %v316_v21, 8.507059e+37 }
 0x375   :  { %v399_v16 = vpop.eup %398 }
 0x376   :  { %v308_v17 = vmul.f32 %v399_v16, %v306_v15  ;;  %vm313_vm8 = vweird.f32 %v399_v16 }
 0x377   :  { %vm314_vm10 = vmor %vm312_vm9, %vm313_vm8 }
 0x378   :  { %v309_v18 = vsub.f32 1.0, %v308_v17 }
 0x37a   :  { %v310_v20 = vmul.f32 %v399_v16, %v309_v18 }
 0x37c   :  { %v311_v22 = vadd.f32 %v399_v16, %v310_v20 }
 0x37e   :  { %v315_v24 = vsel %vm314_vm10, %v399_v16, %v311_v22 }
 0x37f   :  { %v320_v25 = vsel %vm317_vm11, %v319_v23, %v315_v24 }
 0x380   :  { %329 = vst.msk [vmem:[%s565_s13] sm:$0x1] %vm328_vm6, %v320_v25 }

</bundles_post_ra>
